<compile_context>
chip_gen: v7x
topology: tpu7x:2x2x1
jax: 0.10.0
libtpu: 0.0.40
codegen_flags: <defaults>
</compile_context>

<pallas_src>
import functools

import jax
import jax.numpy as jnp
from jax.experimental import pallas as pl
from jax.experimental.pallas import tpu as pltpu


LANE = 128


def _round_up(v, m):
    return ((v + m - 1) // m) * m


def _vmem_limit_bytes():
    """Generation-aware VMEM budget: ~3/4 of physical, capped at 100 MiB
    (v7x: 64 MiB physical -> ~48 MiB; v5e/v6e: 128 MiB -> ~96 MiB)."""
    try:
        cap = int(pltpu.get_tpu_info().vmem_capacity_bytes)
    except Exception:
        cap = 128 * 1024 * 1024
    return max(32 * 1024 * 1024, min((cap * 3) // 4, 100 * 1024 * 1024))


def _pad_n(n):
    """Pad the node dimension so that large reduction tiles divide it while
    keeping the relative zero-padding small."""
    if n <= 1024:
        align = 256
    elif n <= 8192:
        align = 1024
    else:
        align = 2048
    return _round_up(n, align)


def _pick_tiles(npad, hp, cp, vmem_limit, y_resident):
    """Row tile tm (256-512, prefer >= 2 row tiles for v7x megacore) and the
    largest reduction tile tk that divides npad and fits the VMEM budget."""
    if npad % 512 == 0 and npad // 512 >= 2:
        tm = 512
    elif npad % 256 == 0 and npad // 256 >= 2:
        tm = 256
    else:
        tm = npad
    resident = hp * cp * 4 + tm * hp * 4              # w2 + f32 accumulator
    if y_resident:
        resident += 2 * npad * max(hp, cp) * 2        # resident y (2 bufs, worst case)
    out_bufs = 2 * (tm * cp * 4 + tm * LANE * 4)      # double-buffered outputs
    headroom = 2 << 20
    tk = 256
    for cand in (2048, 1024, 512, 256):
        if npad % cand == 0 and (
                resident + 2 * tm * cand * 2 + out_bufs + headroom <= vmem_limit):
            tk = cand
            break
    return tm, tk


def _pad2(a, rows, cols):
    return jnp.pad(a, ((0, rows - a.shape[0]), (0, cols - a.shape[1])))


def _pad1(v, cols):
    return jnp.pad(v, (0, cols - v.shape[0]))


# ---------------------------------------------------------------------------
# Kernel 1: layer-1 projection (x @ W1[:F]) + raw per-node statistics of x.
# Grid: row tiles ("parallel" -> megacore sharding).
# ---------------------------------------------------------------------------
def project_stats_kernel(x_ref, w_ref, xw_ref, stats_ref, *, feat):
    x = x_ref[...]                                                 # (tm, Fp) f32
    # MXU: lane-padded projection (padded cols of x / rows of W are zero).
    xw_ref[...] = jnp.dot(x, w_ref[...], preferred_element_type=jnp.float32)
    # Per-node raw stats (padded zero columns contribute nothing).
    nz = jnp.sum((x != 0.0).astype(jnp.float32), axis=1, keepdims=True)
    sparsity = 1.0 - nz / float(feat)                              # (tm, 1)
    entropy = -jnp.sum(x * jnp.log(x + 1e-15), axis=1, keepdims=True)
    # Lane-dense (tm, 128) full store: col 0 = sparsity, col 1 = entropy.
    col = jax.lax.broadcasted_iota(jnp.int32, stats_ref.shape, 1)
    stats_ref[...] = jnp.where(col == 0, sparsity,
                               jnp.where(col == 1, entropy, 0.0))


# ---------------------------------------------------------------------------
# Kernel 2: layer-1 aggregation h = relu(A @ y1), fused with the layer-2
# projection (h @ W2[:H]) and the raw per-node statistics of h.
# Grid: (row tiles "parallel", reduction tiles "arbitrary", reduction last).
# ---------------------------------------------------------------------------
def agg1_fused_kernel(a_ref, y_ref, w2_ref, hw_ref, stats_ref, acc_ref,
                      *, hidden, tk, y_resident):
    k = pl.program_id(1)

    @pl.when(k == 0)
    def _():
        acc_ref[...] = jnp.zeros_like(acc_ref)

    if y_resident:
        # y lives in VMEM once (index_map -> (0,0)); slice the k-th tile here.
        y_blk = y_ref[pl.ds(pl.multiple_of(k * tk, tk), tk), :]
    else:
        y_blk = y_ref[...]
    # bf16 x bf16 -> f32 accumulate on the MXU.
    acc_ref[...] += jnp.dot(a_ref[...], y_blk,
                            preferred_element_type=jnp.float32)

    @pl.when(k == pl.num_programs(1) - 1)
    def _():
        h = jnp.maximum(acc_ref[...], 0.0)                         # relu, (tm, Hp)
        # Layer-2 projection applied before aggregation (exact by associativity).
        hw_ref[...] = jnp.dot(h, w2_ref[...],
                              preferred_element_type=jnp.float32)  # (tm, Cp)
        nz = jnp.sum((h != 0.0).astype(jnp.float32), axis=1, keepdims=True)
        sparsity = 1.0 - nz / float(hidden)
        entropy = -jnp.sum(h * jnp.log(h + 1e-15), axis=1, keepdims=True)
        col = jax.lax.broadcasted_iota(jnp.int32, stats_ref.shape, 1)
        stats_ref[...] = jnp.where(col == 0, sparsity,
                                   jnp.where(col == 1, entropy, 0.0))


# ---------------------------------------------------------------------------
# Kernel 3: layer-2 aggregation out = A @ y2 with fused, class-masked
# log_softmax epilogue (padded class columns excluded, written as 0).
# ---------------------------------------------------------------------------
def agg2_kernel(a_ref, y_ref, out_ref, acc_ref, *, classes, tk, y_resident):
    k = pl.program_id(1)

    @pl.when(k == 0)
    def _():
        acc_ref[...] = jnp.zeros_like(acc_ref)

    if y_resident:
        y_blk = y_ref[pl.ds(pl.multiple_of(k * tk, tk), tk), :]
    else:
        y_blk = y_ref[...]
    acc_ref[...] += jnp.dot(a_ref[...], y_blk,
                            preferred_element_type=jnp.float32)

    @pl.when(k == pl.num_programs(1) - 1)
    def _():
        logits = acc_ref[...]                                      # (tm, Cp)
        col = jax.lax.broadcasted_iota(jnp.int32, logits.shape, 1)
        valid = col < classes
        masked = jnp.where(valid, logits, -1e30)
        m = jnp.max(masked, axis=1, keepdims=True)
        shifted = masked - m
        sumexp = jnp.sum(jnp.where(valid, jnp.exp(shifted), 0.0),
                         axis=1, keepdims=True)
        out_ref[...] = jnp.where(valid, shifted - jnp.log(sumexp), 0.0)


# ---------------------------------------------------------------------------
# pallas_call wrappers
# ---------------------------------------------------------------------------
def _project_layer1(x_pad, w1x, feat, tm, vmem_limit):
    npad, fp = x_pad.shape
    hp = w1x.shape[1]
    kernel = functools.partial(project_stats_kernel, feat=feat)
    return pl.pallas_call(
        kernel,
        out_shape=(jax.ShapeDtypeStruct((npad, hp), jnp.float32),
                   jax.ShapeDtypeStruct((npad, LANE), jnp.float32)),
        grid_spec=pltpu.PrefetchScalarGridSpec(
            num_scalar_prefetch=0,
            grid=(npad // tm,),
            in_specs=[pl.BlockSpec((tm, fp), lambda i: (i, 0)),
                      pl.BlockSpec((fp, hp), lambda i: (0, 0))],
            out_specs=[pl.BlockSpec((tm, hp), lambda i: (i, 0)),
                       pl.BlockSpec((tm, LANE), lambda i: (i, 0))]),
        compiler_params=pltpu.CompilerParams(
            dimension_semantics=("parallel",),
            vmem_limit_bytes=vmem_limit),
    )(x_pad, w1x)


def _agg_layer1(adj_bf16, y1, w2x, hidden, tm, tk, vmem_limit, y_resident):
    npad = adj_bf16.shape[0]
    hp = y1.shape[1]
    cp = w2x.shape[1]
    kernel = functools.partial(agg1_fused_kernel, hidden=hidden, tk=tk,
                               y_resident=y_resident)
    if y_resident:
        y_spec = pl.BlockSpec((npad, hp), lambda i, k: (0, 0))   # VMEM-resident
    else:
        y_spec = pl.BlockSpec((tk, hp), lambda i, k: (k, 0))     # streamed
    return pl.pallas_call(
        kernel,
        out_shape=(jax.ShapeDtypeStruct((npad, cp), jnp.float32),
                   jax.ShapeDtypeStruct((npad, LANE), jnp.float32)),
        grid_spec=pltpu.PrefetchScalarGridSpec(
            num_scalar_prefetch=0,
            grid=(npad // tm, npad // tk),
            in_specs=[pl.BlockSpec((tm, tk), lambda i, k: (i, k)),
                      y_spec,
                      pl.BlockSpec((hp, cp), lambda i, k: (0, 0))],
            out_specs=[pl.BlockSpec((tm, cp), lambda i, k: (i, 0)),
                       pl.BlockSpec((tm, LANE), lambda i, k: (i, 0))],
            scratch_shapes=[pltpu.VMEM((tm, hp), jnp.float32)]),
        compiler_params=pltpu.CompilerParams(
            dimension_semantics=("parallel", "arbitrary"),
            vmem_limit_bytes=vmem_limit),
    )(adj_bf16, y1, w2x)


def _agg_layer2(adj_bf16, y2, classes, tm, tk, vmem_limit, y_resident):
    npad = adj_bf16.shape[0]
    cp = y2.shape[1]
    kernel = functools.partial(agg2_kernel, classes=classes, tk=tk,
                               y_resident=y_resident)
    if y_resident:
        y_spec = pl.BlockSpec((npad, cp), lambda i, k: (0, 0))
    else:
        y_spec = pl.BlockSpec((tk, cp), lambda i, k: (k, 0))
    return pl.pallas_call(
        kernel,
        out_shape=jax.ShapeDtypeStruct((npad, cp), jnp.float32),
        grid_spec=pltpu.PrefetchScalarGridSpec(
            num_scalar_prefetch=0,
            grid=(npad // tm, npad // tk),
            in_specs=[pl.BlockSpec((tm, tk), lambda i, k: (i, k)),
                      y_spec],
            out_specs=pl.BlockSpec((tm, cp), lambda i, k: (i, 0)),
            scratch_shapes=[pltpu.VMEM((tm, cp), jnp.float32)]),
        compiler_params=pltpu.CompilerParams(
            dimension_semantics=("parallel", "arbitrary"),
            vmem_limit_bytes=vmem_limit),
    )(adj_bf16, y2)


# ---------------------------------------------------------------------------
# Glue (tiny, O(N) work): global min/max normalization of the stats over the
# REAL nodes only, and formation of y = x@W[:F] + s*W[F] + e*W[F+1].
# ---------------------------------------------------------------------------
def _normalize_stats(stats, n_real):
    s = stats[:, 0:1]
    e = stats[:, 1:2]
    sv, ev = s[:n_real], e[:n_real]
    # Epsilon guard: reference divides by (max - min), which is 0/0 for
    # constant stats; guard avoids NaN while matching it otherwise.
    s = (s - jnp.min(sv)) / jnp.maximum(jnp.max(sv) - jnp.min(sv), 1e-12)
    e = (e - jnp.min(ev)) / jnp.maximum(jnp.max(ev) - jnp.min(ev), 1e-12)
    return s, e


def _make_y(proj, stats, w_s, w_e, n_real):
    s, e = _normalize_stats(stats, n_real)
    y = proj + s * w_s[None, :] + e * w_e[None, :]
    return y.astype(jnp.bfloat16)   # bf16 MXU input; aggregation accumulates f32


def build_adjacency(edge_index, num_nodes, npad):
    """Dense aggregation matrix A[i, j] = #edges (source j -> target i),
    built directly in bf16 (exact small-int edge counts, valid up to 256
    parallel edges per pair). Hoist/cache this when the graph is static."""
    del num_nodes  # indices already < num_nodes <= npad
    row, col = edge_index[0], edge_index[1]
    return jnp.zeros((npad, npad), jnp.bfloat16).at[col, row].add(1.0)


def gcn_model_forward(x, edge_index, w1, w2, adj_bf16=None):
    """GCNModel.forward: conv1 -> relu -> dropout(eval) -> conv2 -> log_softmax."""
    n, f = x.shape
    h_dim = w1.shape[1]
    c_dim = w2.shape[1]
    assert w1.shape[0] == f + 2 and w2.shape[0] == h_dim + 2

    fp = _round_up(f, LANE)
    hp = _round_up(h_dim, LANE)
    cp = _round_up(c_dim, LANE)
    npad = _pad_n(n)

    vmem_limit = _vmem_limit_bytes()
    # Keep y (the pre-aggregation operand) resident in VMEM unless it would
    # crowd out the A tiles (very large graphs -> fall back to streaming).
    y_resident = 2 * npad * max(hp, cp) * 2 <= vmem_limit // 3
    tm, tk = _pick_tiles(npad, hp, cp, vmem_limit, y_resident)

    if adj_bf16 is None:
        adj_bf16 = build_adjacency(edge_index, n, npad)

    # Lane-pad feature / hidden / class dims and node dim; split each weight
    # into its feature block plus the two statistics rows (replaces the
    # width-1 concat columns of the PyTorch code with lane-dense operands).
    x_pad = _pad2(x, npad, fp)
    w1x = _pad2(w1[:f], fp, hp)
    w1s, w1e = _pad1(w1[f], hp), _pad1(w1[f + 1], hp)
    w2x = _pad2(w2[:h_dim], hp, cp)
    w2s, w2e = _pad1(w2[h_dim], cp), _pad1(w2[h_dim + 1], cp)

    # NOTE: compute_edge_weight / neighbor_weights never affect the output
    # (CustomGCNConv.message() returns x_j only), so they are skipped.

    # Layer 1: projection + node stats of x (Pallas), then global normalization.
    xw1, stats1 = _project_layer1(x_pad, w1x, f, tm, vmem_limit)
    y1 = _make_y(xw1, stats1, w1s, w1e, n)                   # [Np, Hp] bf16

    # Layer-1 aggregation + relu, fused with layer-2 projection + stats of h.
    hw2, stats2 = _agg_layer1(adj_bf16, y1, w2x, h_dim, tm, tk, vmem_limit,
                              y_resident)
    # Dropout(p=0.2) is identity in eval mode.
    y2 = _make_y(hw2, stats2, w2s, w2e, n)                   # [Np, Cp] bf16

    # Layer-2 aggregation + class-masked log_softmax.
    out_pad = _agg_layer2(adj_bf16, y2, c_dim, tm, tk, vmem_limit, y_resident)
    return out_pad[:n, :c_dim]


def xavier_uniform(key, shape):
    fan_in, fan_out = shape
    bound = float(jnp.sqrt(6.0 / (fan_in + fan_out)))
    return jax.random.uniform(key, shape, jnp.float32, minval=-bound, maxval=bound)


if __name__ == "__main__":
    # Small synthetic graph consistent with the module's signature.
    N = 16            # num_nodes
    F_IN = 8          # num_features
    H = 32            # num_hidden
    C = 8             # num_classes
    E = 48            # num_edges

    key = jax.random.PRNGKey(0)
    kx, kmask, ke1, ke2, kw1, kw2 = jax.random.split(key, 6)

    # Non-negative node features with some exact zeros (so sparsity / entropy
    # statistics are well-defined and non-constant).
    x = jax.random.uniform(kx, (N, F_IN), jnp.float32, minval=0.1, maxval=1.0)
    drop_mask = jax.random.bernoulli(kmask, 0.7, (N, F_IN)).astype(jnp.float32)
    drop_mask = drop_mask.at[0, :4].set(0.0).at[1, :].set(1.0)
    x = x * drop_mask

    edge_index = jnp.stack(
        [
            jax.random.randint(ke1, (E,), 0, N),  # row (source)
            jax.random.randint(ke2, (E,), 0, N),  # col (target)
        ],
        axis=0,
    ).astype(jnp.int32)

    # Deterministic parameter init (xavier_uniform, as in reset_parameters()).
    w1 = xavier_uniform(kw1, (F_IN + 2, H))   # conv1: (num_features+2, num_hidden)
    w2 = xavier_uniform(kw2, (H + 2, C))      # conv2: (num_hidden+2, num_classes)

    # Adjacency hoisted out of the forward (static graph -> build once).
    adj_bf16 = build_adjacency(edge_index, N, _pad_n(N))

    out = gcn_model_forward(x, edge_index, w1, w2, adj_bf16=adj_bf16)
    out = jax.block_until_ready(out)

    assert out.shape == (N, C)
    assert bool(jnp.all(jnp.isfinite(out)))
    print("KERNEL_OK")
</pallas_src>

<mosaic_0001>
module attributes {stable_mosaic.version = 11 : i64} {
  func.func @project_stats_kernel(%arg0: i32, %arg1: memref<256x128xf32, #tpu.memory_space<vmem>>, %arg2: memref<128x128xf32, #tpu.memory_space<vmem>>, %arg3: memref<256x128xf32, #tpu.memory_space<vmem>>, %arg4: memref<256x128xf32, #tpu.memory_space<vmem>>) attributes {dimension_semantics = [#tpu.dimension_semantics<parallel>], iteration_bounds = array<i64: 1>, scalar_prefetch = 0 : i64, scratch_operands = 0 : i64, tpu.core_type = #tpu.core_type<tc>, window_params = [{transform_indices = @transform_0, window_bounds = array<i64: 256, 128>}, {pipeline_mode = #tpu.pipeline_mode<synchronous>, transform_indices = @transform_1, window_bounds = array<i64: 128, 128>}, {transform_indices = @transform_2, window_bounds = array<i64: 256, 128>}, {transform_indices = @transform_3, window_bounds = array<i64: 256, 128>}]} {
    %c0 = arith.constant 0 : index
    %c0_0 = arith.constant 0 : index
    %0 = vector.load %arg1[%c0, %c0_0] : memref<256x128xf32, #tpu.memory_space<vmem>>, vector<256x128xf32>
    %c0_1 = arith.constant 0 : index
    %c0_2 = arith.constant 0 : index
    %1 = vector.load %arg2[%c0_1, %c0_2] : memref<128x128xf32, #tpu.memory_space<vmem>>, vector<128x128xf32>
    %cst = arith.constant dense<0.000000e+00> : vector<256x128xf32>
    %2 = tpu.matmul %0, %1, %cst {dimension_numbers = #tpu.dot_dimension_numbers<[1], [0], [0], [1], [0, 0, 1, 1], [], []>} : vector<256x128xf32>, vector<128x128xf32>, vector<256x128xf32> -> vector<256x128xf32>
    %c0_3 = arith.constant 0 : index
    %c0_4 = arith.constant 0 : index
    %3 = vector.load %arg3[%c0_3, %c0_4] : memref<256x128xf32, #tpu.memory_space<vmem>>, vector<256x128xf32>
    tpu.vector_store %arg3[%c0_3, %c0_4], %2 {strides = array<i32>} : memref<256x128xf32, #tpu.memory_space<vmem>>, vector<256x128xf32>,
    %cst_5 = arith.constant 0.000000e+00 : f32
    %4 = vector.broadcast %cst_5 : f32 to vector<256x128xf32>
    %5 = arith.cmpf one, %0, %4 : vector<256x128xf32>
    %6 = arith.extui %5 : vector<256x128xi1> to vector<256x128xi32>
    %7 = arith.sitofp %6 : vector<256x128xi32> to vector<256x128xf32>
    %cst_6 = arith.constant dense<0.000000e+00> : vector<256xf32>
    %8 = vector.multi_reduction <add>, %7, %cst_6 [1] : vector<256x128xf32> to vector<256xf32>
    %9 = vector.shape_cast %8 : vector<256xf32> to vector<256x1xf32>
    %cst_7 = arith.constant 8.000000e+00 : f32
    %10 = vector.broadcast %cst_7 : f32 to vector<256x1xf32>
    %11 = arith.divf %9, %10 : vector<256x1xf32>
    %cst_8 = arith.constant 1.000000e+00 : f32
    %12 = vector.broadcast %cst_8 : f32 to vector<256x1xf32>
    %13 = arith.subf %12, %11 : vector<256x1xf32>
    %cst_9 = arith.constant 1.000000e-15 : f32
    %14 = vector.broadcast %cst_9 : f32 to vector<256x128xf32>
    %15 = arith.addf %0, %14 : vector<256x128xf32>
    %16 = math.log %15 : vector<256x128xf32>
    %17 = arith.mulf %0, %16 : vector<256x128xf32>
    %cst_10 = arith.constant dense<0.000000e+00> : vector<256xf32>
    %18 = vector.multi_reduction <add>, %17, %cst_10 [1] : vector<256x128xf32> to vector<256xf32>
    %19 = vector.shape_cast %18 : vector<256xf32> to vector<256x1xf32>
    %cst_11 = arith.constant 0.000000e+00 : f32
    %20 = vector.broadcast %cst_11 : f32 to vector<256x1xf32>
    %21 = arith.subf %20, %19 : vector<256x1xf32>
    %22 = tpu.iota {dimensions = array<i32: 1>} : vector<256x128xi32>
    %c0_i32 = arith.constant 0 : i32
    %23 = vector.broadcast %c0_i32 : i32 to vector<256x128xi32>
    %24 = arith.cmpi eq, %22, %23 : vector<256x128xi32>
    %c1_i32 = arith.constant 1 : i32
    %25 = vector.broadcast %c1_i32 : i32 to vector<256x128xi32>
    %26 = arith.cmpi eq, %22, %25 : vector<256x128xi32>
    %cst_12 = arith.constant 0.000000e+00 : f32
    %27 = vector.shape_cast %21 : vector<256x1xf32> to vector<256x1xf32>
    %28 = vector.broadcast %27 : vector<256x1xf32> to vector<256x128xf32>
    %29 = vector.broadcast %cst_12 : f32 to vector<256x128xf32>
    %30 = arith.select %26, %28, %29 : vector<256x128xi1>, vector<256x128xf32>
    %31 = vector.shape_cast %13 : vector<256x1xf32> to vector<256x1xf32>
    %32 = vector.broadcast %31 : vector<256x1xf32> to vector<256x128xf32>
    %33 = arith.select %24, %32, %30 : vector<256x128xi1>, vector<256x128xf32>
    %c0_13 = arith.constant 0 : index
    %c0_14 = arith.constant 0 : index
    %34 = vector.load %arg4[%c0_13, %c0_14] : memref<256x128xf32, #tpu.memory_space<vmem>>, vector<256x128xf32>
    tpu.vector_store %arg4[%c0_13, %c0_14], %33 {strides = array<i32>} : memref<256x128xf32, #tpu.memory_space<vmem>>, vector<256x128xf32>,
    return
  }
  func.func @transform_0(%arg0: i32) -> (i32, i32) {
    %c0_i32 = arith.constant 0 : i32
    %c0_i32_0 = arith.constant 0 : i32
    return %arg0, %c0_i32 : i32, i32
  }
  func.func @transform_1(%arg0: i32) -> (i32, i32) {
    %c0_i32 = arith.constant 0 : i32
    %c0_i32_0 = arith.constant 0 : i32
    %c0_i32_1 = arith.constant 0 : i32
    return %c0_i32, %c0_i32_0 : i32, i32
  }
  func.func @transform_2(%arg0: i32) -> (i32, i32) {
    %c0_i32 = arith.constant 0 : i32
    %c0_i32_0 = arith.constant 0 : i32
    return %arg0, %c0_i32 : i32, i32
  }
  func.func @transform_3(%arg0: i32) -> (i32, i32) {
    %c0_i32 = arith.constant 0 : i32
    %c0_i32_0 = arith.constant 0 : i32
    return %arg0, %c0_i32 : i32, i32
  }
}

</mosaic_0001>

<bundles_post_ra>
// kernel: tpu_custom_call.1
= control target key start
LH: loop header
LB: loop body
LE: loop exit
PB: predicated region body
PF: predicated region fallthrough
CT: control target
= control target key end

     0   :  { %9 = vsyncpa [#allocation3], 0  ;;  %s1835_s0 = inlined_call_operand.hbm [shape: f32[256,128], index: 0, kind: input, shape index: {}]   ;;  %s1836_s1 = inlined_call_operand.hbm [shape: f32[128,128], index: 1, kind: input, shape index: {}]   ;;  %s1837_s2 = inlined_call_operand.hbm [shape: f32[256,128], index: 2, kind: output, shape index: {0}]   ;;  %s1838_s3 = inlined_call_operand.hbm [shape: f32[256,128], index: 3, kind: output, shape index: {1}]  }
   0x1   :  { %10 = vsyncpa [#allocation6], 0 }
   0x2   :  { %11 = vsyncpa [#allocation4], 0 }
   0x3   :  { %12 = vsyncpa [#allocation9], 0  ;;  %s1306_s12 = smov [#allocation2]   ;;  %s1210_s16 = scalar_lea.hbm %s1835_s0, 4096 }
   0x4   :  { %s18_s13 = sshll.u32 %s1306_s12, 4  ;;  %p1211_p0 = scmp.ne.s32.totalorder %s1835_s0, %s1210_s16  ;;  %s19_s13 = int_to_ptr.vmem [resolvable:$true] %s18_s13 }
   0x5   :  { %p1214_p1 = scmp.lt.u32.totalorder %s1210_s16, %s1835_s0 }
   0x7   :  { %p1216_p2 = pnand %p1214_p1, %p1211_p0 }
   0x9   :  { %1219 = shalt.err (!%p1216_p2)
}
   0xa   :  { %s1220_s21 = scalar_lea.vmem %s19_s13, 4096  ;;  %p1225_p4 = scmp.lt.s32.totalorder %s19_s13, %s19_s13 }
   0xb   :  { %p1221_p3 = scmp.ne.s32.totalorder %s19_s13, %s1220_s21  ;;  %p1226_p5 = scmp.lt.s32.totalorder %s1220_s21, %s1220_s21 }
   0xd   :  { %p1227_p6 = por %p1226_p5, %p1225_p4 }
   0xf   :  { %p1228_p7 = pnand %p1227_p6, %p1221_p3 }
  0x11   :  { %1231 = shalt.err (!%p1228_p7)
}
  0x12   :  { %s1307_s22 = smov 128   ;;  %s1308_s23 = smov 8  }
  0x13   :  { %24 = dma.hbm_to_vmem [thread:$0]  %s1835_s0, 4096, %s19_s13, [#allocation3], %s1307_s22, %s1307_s22, %s1308_s23  }
  0x14   :  { %s1309_s26 = smov [#allocation5]   ;;  %s1232_s30 = scalar_lea.hbm %s1836_s1, 2048 }
  0x15   :  { %s30_s27 = sshll.u32 %s1309_s26, 4  ;;  %p1233_p8 = scmp.ne.s32.totalorder %s1836_s1, %s1232_s30  ;;  %s31_s27 = int_to_ptr.vmem [resolvable:$true] %s30_s27 }
  0x16   :  { %p1236_p9 = scmp.lt.u32.totalorder %s1232_s30, %s1836_s1 }
  0x18   :  { %p1238_p10 = pnand %p1236_p9, %p1233_p8 }
  0x1a   :  { %1241 = shalt.err (!%p1238_p10)
}
  0x1b   :  { %s1242_s8 = scalar_lea.vmem %s31_s27, 2048  ;;  %p1247_p12 = scmp.lt.s32.totalorder %s31_s27, %s31_s27 }
  0x1c   :  { %p1243_p11 = scmp.ne.s32.totalorder %s31_s27, %s1242_s8  ;;  %p1248_p13 = scmp.lt.s32.totalorder %s1242_s8, %s1242_s8 }
  0x1e   :  { %p1249_p0 = por %p1248_p13, %p1247_p12 }
  0x20   :  { %p1250_p1 = pnand %p1249_p0, %p1243_p11 }
  0x22   :  { %1253 = shalt.err (!%p1250_p1)
}
  0x23   :  { %36 = dma.hbm_to_vmem [thread:$0]  %s1836_s1, 2048, %s31_s27, [#allocation6], %s1307_s22, %s1307_s22, %s1308_s23  }
  0x24   :  { %1298 = dma.done.wait [#allocation3], 4096  }
  0x25   :  { %1299 = vsyncadd [#allocation3], 4294963200 }
  0x26   :  { %1300 = dma.done.wait [#allocation6], 2048  }
  0x27   :  { %1301 = vsyncadd [#allocation6], 4294965248  ;;  %v75_v0 = vld [vmem:[#allocation5] sm:$0xff]  ;;  %v76_v1 = vld [vmem:[#allocation5 + $0x8] sm:$0xff]  ;;  %v1310_v7 = vmov 0.0   ;;  %s1311_s1 = smov [#allocation8]  }
  0x28   :  { %v1363_v2 = vld [vmem:[#allocation2 + $0x10] sm:$0xff]  ;;  %v1091_v3 = vpack.c.bf16 %v76_v1, %v75_v0  ;;  %v1366_v4 = vld [vmem:[#allocation2] sm:$0xff]  ;;  %v78_v6 = vld [vmem:[#allocation5 + $0x18] sm:$0xff]  ;;  %s914_s10 = sshll.u32 %s1311_s1, 4  ;;  %s1312_s11 = smov [#allocation7]   ;;  %s915_s10 = int_to_ptr.vmem [resolvable:$true] %s914_s10 }
  0x29   :  { %vm350_vm0 = vcmp.ne.f32.partialorder %v1363_v2, 0.0  ;;  %v77_v5 = vld [vmem:[#allocation5 + $0x10] sm:$0xff]  ;;  %vm348_vm1 = vcmp.ne.f32.partialorder %v1366_v4, 0.0  ;;  %v1370_v10 = vld [vmem:[#allocation2 + $0x18] sm:$0xff]  ;;  %v1372_v11 = vld [vmem:[#allocation2 + $0x8] sm:$0xff]  ;;  %1043 = vmatprep.mubr.f32.mxu0 %v1366_v4  ;;  %s902_s12 = sshll.u32 %s1312_s11, 4  ;;  %p1259_p3 = scmp.lt.s32.totalorder %s915_s10, %s915_s10  ;;  %s1798_s12 = int_to_ptr.vmem [resolvable:$true] %s902_s12 }
  0x2a   :  { %v933_v8 = vsel %vm350_vm0, 1.0, %v1310_v7  ;;  %v1095_v9 = vpack.c.bf16 %v78_v6, %v77_v5  ;;  %v79_v12 = vld [vmem:[#allocation5 + $0x20] sm:$0xff]  ;;  %1092 = vmatprep.subr.bf16.mxu0 %v1091_v3  ;;  %1123 = vmatprep.subr.bf16.mxu1 %v1091_v3  ;;  %v931_v13 = vsel %vm348_vm1, 1.0, %v1310_v7  ;;  %vm351_vm2 = vcmp.ne.f32.partialorder %v1370_v10, 0.0  ;;  %v80_v14 = vld [vmem:[#allocation5 + $0x28] sm:$0xff]  ;;  %v81_v20 = vld [vmem:[#allocation5 + $0x30] sm:$0xff] }
  0x2b   :  { %vm349_vm3 = vcmp.ne.f32.partialorder %v1372_v11, 0.0  ;;  %v1378_v15 = vld [vmem:[#allocation2 + $0x28] sm:$0xff]  ;;  %v1380_v16 = vld [vmem:[#allocation2 + $0x20] sm:$0xff]  ;;  %448 = vadd.xlane.f32.xlu1 %v933_v8  ;;  %444 = vadd.xlane.f32.xlu0 %v931_v13  ;;  %v934_v17 = vsel %vm351_vm2, 1.0, %v1310_v7  ;;  %v1099_v19 = vpack.c.bf16 %v80_v14, %v79_v12  ;;  %v82_v21 = vld [vmem:[#allocation5 + $0x38] sm:$0xff]  ;;  %s1254_s13 = scalar_lea.vmem %s915_s10, 4096 }
  0x2c   :  { %1094 = vmatpush3.bf16.msra.mxu0 %v1091_v3  ;;  %1131 = vmatpush3.bf16.msra.mxu1 %v1091_v3  ;;  %v932_v18 = vsel %vm349_vm3, 1.0, %v1310_v7  ;;  %vm353_vm4 = vcmp.ne.f32.partialorder %v1378_v15, 0.0  ;;  %vm352_vm5 = vcmp.ne.f32.partialorder %v1380_v16, 0.0  ;;  %v1386_v22 = vld [vmem:[#allocation2 + $0x38] sm:$0xff]  ;;  %v1388_v23 = vld [vmem:[#allocation2 + $0x30] sm:$0xff]  ;;  %v1103_v26 = vpack.c.bf16 %v82_v21, %v81_v20  ;;  %v83_v27 = vld [vmem:[#allocation5 + $0x40] sm:$0xff]  ;;  %p1255_p2 = scmp.ne.s32.totalorder %s915_s10, %s1254_s13  ;;  %p1260_p4 = scmp.lt.s32.totalorder %s1254_s13, %s1254_s13 }
  0x2d   :  { %1096 = vmatprep.subr.bf16.mxu0 %v1095_v9  ;;  %1124 = vmatprep.subr.bf16.mxu1 %v1095_v9  ;;  %v936_v24 = vsel %vm353_vm4, 1.0, %v1310_v7  ;;  %v935_v25 = vsel %vm352_vm5, 1.0, %v1310_v7  ;;  %vm355_vm6 = vcmp.ne.f32.partialorder %v1386_v22, 0.0  ;;  %vm354_vm7 = vcmp.ne.f32.partialorder %v1388_v23, 0.0  ;;  %v1394_v28 = vld [vmem:[#allocation2 + $0x80] sm:$0xff]  ;;  %v84_v29 = vld [vmem:[#allocation5 + $0x48] sm:$0xff] }
  0x2e   :  { %v1396_v30 = vld [vmem:[#allocation2 + $0x48] sm:$0xff]  ;;  %v1398_v31 = vld [vmem:[#allocation2 + $0x40] sm:$0xff]  ;;  %1067 = vmatprep.mubr.f32.mxu1 %v1394_v28  ;;  %v938_v32 = vsel %vm355_vm6, 1.0, %v1310_v7  ;;  %v937_v33 = vsel %vm354_vm7, 1.0, %v1310_v7  ;;  %v1107_v34 = vpack.c.bf16 %v84_v29, %v83_v27  ;;  %v85_v35 = vld [vmem:[#allocation5 + $0x50] sm:$0xff]  ;;  %vm364_vm1 = vcmp.ne.f32.partialorder %v1394_v28, 0.0  ;;  %p1261_p5 = por %p1260_p4, %p1259_p3 }
  0x2f   :  { %450 = vadd.xlane.f32.xlu1 %v934_v17  ;;  %446 = vadd.xlane.f32.xlu0 %v932_v18  ;;  %vm357_vm8 = vcmp.ne.f32.partialorder %v1396_v30, 0.0  ;;  %vm356_vm9 = vcmp.ne.f32.partialorder %v1398_v31, 0.0  ;;  %v86_v36 = vld [vmem:[#allocation5 + $0x58] sm:$0xff]  ;;  %v1407_v38 = vld [vmem:[#allocation2 + $0x50] sm:$0xff]  ;;  %v87_v42 = vld [vmem:[#allocation5 + $0x60] sm:$0xff]  ;;  %v947_v62 = vsel %vm364_vm1, 1.0, %v1310_v7 }
  0x30   :  { %1098 = vmatpush3.bf16.msra.mxu0 %v1095_v9  ;;  %1132 = vmatpush3.bf16.msra.mxu1 %v1095_v9  ;;  %v1405_v37 = vld [vmem:[#allocation2 + $0x58] sm:$0xff]  ;;  %v940_v39 = vsel %vm357_vm8, 1.0, %v1310_v7  ;;  %v939_v40 = vsel %vm356_vm9, 1.0, %v1310_v7  ;;  %v1111_v41 = vpack.c.bf16 %v86_v36, %v85_v35  ;;  %vm358_vm11 = vcmp.ne.f32.partialorder %v1407_v38, 0.0  ;;  %v88_v43 = vld [vmem:[#allocation5 + $0x68] sm:$0xff]  ;;  %v1415_v45 = vld [vmem:[#allocation2 + $0x60] sm:$0xff]  ;;  %p1262_p6 = pnand %p1261_p5, %p1255_p2 }
  0x31   :  { %1100 = vmatprep.subr.bf16.mxu0 %v1099_v19  ;;  %1125 = vmatprep.subr.bf16.mxu1 %v1099_v19  ;;  %vm359_vm10 = vcmp.ne.f32.partialorder %v1405_v37, 0.0  ;;  %v1413_v44 = vld [vmem:[#allocation2 + $0x68] sm:$0xff]  ;;  %v941_v47 = vsel %vm358_vm11, 1.0, %v1310_v7  ;;  %v1115_v48 = vpack.c.bf16 %v88_v43, %v87_v42  ;;  %vm360_vm13 = vcmp.ne.f32.partialorder %v1415_v45, 0.0  ;;  %v89_v49 = vld [vmem:[#allocation5 + $0x70] sm:$0xff]  ;;  %v90_v50 = vld [vmem:[#allocation5 + $0x78] sm:$0xff] }
  0x32   :  { %v942_v46 = vsel %vm359_vm10, 1.0, %v1310_v7  ;;  %vm361_vm12 = vcmp.ne.f32.partialorder %v1413_v44, 0.0  ;;  %v1421_v51 = vld [vmem:[#allocation2 + $0x78] sm:$0xff]  ;;  %v1423_v52 = vld [vmem:[#allocation2 + $0x70] sm:$0xff]  ;;  %v943_v54 = vsel %vm360_vm13, 1.0, %v1310_v7  ;;  %v1119_v55 = vpack.c.bf16 %v90_v50, %v89_v49  ;;  %v1429_v56 = vld [vmem:[#allocation2 + $0x88] sm:$0xff] }
  0x33   :  { %454 = vadd.xlane.f32.xlu1 %v936_v24  ;;  %452 = vadd.xlane.f32.xlu0 %v935_v25  ;;  %v944_v53 = vsel %vm361_vm12, 1.0, %v1310_v7  ;;  %vm363_vm14 = vcmp.ne.f32.partialorder %v1421_v51, 0.0  ;;  %vm362_vm15 = vcmp.ne.f32.partialorder %v1423_v52, 0.0  ;;  %vm365_vm0 = vcmp.ne.f32.partialorder %v1429_v56, 0.0  ;;  %v1435_v59 = vld [vmem:[#allocation2 + $0x98] sm:$0xff]  ;;  %v1437_v60 = vld [vmem:[#allocation2 + $0x90] sm:$0xff] }
  0x34   :  { %1102 = vmatpush3.bf16.msra.mxu0 %v1099_v19  ;;  %1133 = vmatpush3.bf16.msra.mxu1 %v1099_v19  ;;  %v946_v57 = vsel %vm363_vm14, 1.0, %v1310_v7  ;;  %v945_v58 = vsel %vm362_vm15, 1.0, %v1310_v7  ;;  %v948_v61 = vsel %vm365_vm0, 1.0, %v1310_v7  ;;  %vm367_vm2 = vcmp.ne.f32.partialorder %v1435_v59, 0.0  ;;  %v1443_v63 = vld [vmem:[#allocation2 + $0xa8] sm:$0xff]  ;;  %v1446_v0 = vld [vmem:[#allocation2 + $0xa0] sm:$0xff] }
  0x35   :  { %1104 = vmatprep.subr.bf16.mxu0 %v1103_v26  ;;  %1126 = vmatprep.subr.bf16.mxu1 %v1103_v26  ;;  %vm366_vm3 = vcmp.ne.f32.partialorder %v1437_v60, 0.0  ;;  %v950_v1 = vsel %vm367_vm2, 1.0, %v1310_v7  ;;  %vm369_vm4 = vcmp.ne.f32.partialorder %v1443_v63, 0.0  ;;  %vm368_vm5 = vcmp.ne.f32.partialorder %v1446_v0, 0.0  ;;  %v1455_v5 = vld [vmem:[#allocation2 + $0xb8] sm:$0xff]  ;;  %v1458_v6 = vld [vmem:[#allocation2 + $0xb0] sm:$0xff] }
  0x36   :  { %v949_v3 = vsel %vm366_vm3, 1.0, %v1310_v7  ;;  %v952_v8 = vsel %vm369_vm4, 1.0, %v1310_v7  ;;  %v951_v9 = vsel %vm368_vm5, 1.0, %v1310_v7  ;;  %vm371_vm6 = vcmp.ne.f32.partialorder %v1455_v5, 0.0  ;;  %v1467_v12 = vld [vmem:[#allocation2 + $0xc8] sm:$0xff]  ;;  %v1471_v14 = vld [vmem:[#allocation2 + $0xc0] sm:$0xff] }
  0x37   :  { %458 = vadd.xlane.f32.xlu1 %v938_v32  ;;  %456 = vadd.xlane.f32.xlu0 %v937_v33  ;;  %vm370_vm7 = vcmp.ne.f32.partialorder %v1458_v6, 0.0  ;;  %v574_v13 = vadd.f32 1e-15, %v1372_v11  ;;  %v573_v17 = vadd.f32 1e-15, %v1366_v4  ;;  %v954_v18 = vsel %vm371_vm6, 1.0, %v1310_v7 }
  0x38   :  { %1106 = vmatpush3.bf16.msra.mxu0 %v1103_v26  ;;  %1134 = vmatpush3.bf16.msra.mxu1 %v1103_v26  ;;  %v953_v19 = vsel %vm370_vm7, 1.0, %v1310_v7  ;;  %vm373_vm8 = vcmp.ne.f32.partialorder %v1467_v12, 0.0  ;;  %vm372_vm9 = vcmp.ne.f32.partialorder %v1471_v14, 0.0  ;;  %v1481_v20 = vld [vmem:[#allocation2 + $0xd8] sm:$0xff]  ;;  %v576_v21 = vadd.f32 1e-15, %v1370_v10 }
  0x39   :  { %1108 = vmatprep.subr.bf16.mxu0 %v1107_v34  ;;  %1127 = vmatprep.subr.bf16.mxu1 %v1107_v34  ;;  %1146 = vlog2.f32 %v574_v13  ;;  %v1485_v24 = vld [vmem:[#allocation2 + $0xd0] sm:$0xff]  ;;  %v575_v25 = vadd.f32 1e-15, %v1363_v2  ;;  %v956_v26 = vsel %vm373_vm8, 1.0, %v1310_v7  ;;  %v955_v27 = vsel %vm372_vm9, 1.0, %v1310_v7  ;;  %v1495_v29 = vld [vmem:[#allocation2 + $0xe8] sm:$0xff] }
  0x3a   :  { %1148 = vlog2.f32 %v573_v17  ;;  %vm375_vm10 = vcmp.ne.f32.partialorder %v1481_v20, 0.0  ;;  %vm374_vm11 = vcmp.ne.f32.partialorder %v1485_v24, 0.0  ;;  %v578_v32 = vadd.f32 1e-15, %v1378_v15  ;;  %v1499_v33 = vld [vmem:[#allocation2 + $0xe0] sm:$0xff] }
  0x3b   :  { %462 = vadd.xlane.f32.xlu1 %v940_v39  ;;  %460 = vadd.xlane.f32.xlu0 %v939_v40  ;;  %1150 = vlog2.f32 %v576_v21  ;;  %v958_v35 = vsel %vm375_vm10, 1.0, %v1310_v7  ;;  %v957_v36 = vsel %vm374_vm11, 1.0, %v1310_v7  ;;  %vm377_vm12 = vcmp.ne.f32.partialorder %v1495_v29, 0.0  ;;  %v1509_v39 = vld [vmem:[#allocation2 + $0xf8] sm:$0xff] }
  0x3c   :  { %1110 = vmatpush3.bf16.msra.mxu0 %v1107_v34  ;;  %1135 = vmatpush3.bf16.msra.mxu1 %v1107_v34  ;;  %1152 = vlog2.f32 %v575_v25  ;;  %v577_v34 = vadd.f32 1e-15, %v1380_v16  ;;  %vm376_vm13 = vcmp.ne.f32.partialorder %v1499_v33, 0.0  ;;  %v580_v40 = vadd.f32 1e-15, %v1386_v22 }
  0x3d   :  { %1112 = vmatprep.subr.bf16.mxu0 %v1111_v41  ;;  %1128 = vmatprep.subr.bf16.mxu1 %v1111_v41  ;;  %1154 = vlog2.f32 %v578_v32  ;;  %v579_v42 = vadd.f32 1e-15, %v1388_v23  ;;  %vm379_vm14 = vcmp.ne.f32.partialorder %v1509_v39, 0.0  ;;  %v582_v49 = vadd.f32 1e-15, %v1396_v30 }
  0x3e   :  { %1156 = vlog2.f32 %v577_v34 }
  0x3f   :  { %466 = vadd.xlane.f32.xlu1 %v942_v46  ;;  %464 = vadd.xlane.f32.xlu0 %v941_v47  ;;  %v960_v46 = vsel %vm377_vm12, 1.0, %v1310_v7  ;;  %1158 = vlog2.f32 %v580_v40 }
  0x40   :  { %1114 = vmatpush3.bf16.msra.mxu0 %v1111_v41  ;;  %1136 = vmatpush3.bf16.msra.mxu1 %v1111_v41  ;;  %v1513_v41 = vld [vmem:[#allocation2 + $0xf0] sm:$0xff]  ;;  %1160 = vlog2.f32 %v579_v42 }
  0x41   :  { %1116 = vmatprep.subr.bf16.mxu0 %v1115_v48  ;;  %1129 = vmatprep.subr.bf16.mxu1 %v1115_v48  ;;  %vm378_vm15 = vcmp.ne.f32.partialorder %v1513_v41, 0.0  ;;  %1162 = vlog2.f32 %v582_v49 }
  0x43   :  { %470 = vadd.xlane.f32.xlu1 %v944_v53  ;;  %468 = vadd.xlane.f32.xlu0 %v943_v54  ;;  %v1147_v43 = vpop.eup %1146  ;;  %v581_v53 = vadd.f32 1e-15, %v1398_v31 }
  0x44   :  { %1118 = vmatpush3.bf16.msra.mxu0 %v1115_v48  ;;  %1137 = vmatpush3.bf16.msra.mxu1 %v1115_v48  ;;  %v1149_v47 = vpop.eup %1148  ;;  %v959_v48 = vsel %vm376_vm13, 1.0, %v1310_v7  ;;  %v608_v50 = vmul.f32 0.6931472, %v1147_v43 }
  0x45   :  { %1120 = vmatprep.subr.bf16.mxu0 %v1119_v55  ;;  %1130 = vmatprep.subr.bf16.mxu1 %v1119_v55  ;;  %v1151_v54 = vpop.eup %1150  ;;  %1164 = vlog2.f32 %v581_v53 }
  0x47   :  { %474 = vadd.xlane.f32.xlu1 %v946_v57  ;;  %472 = vadd.xlane.f32.xlu0 %v945_v58  ;;  %v606_v57 = vmul.f32 0.6931472, %v1149_v47  ;;  %v1153_v58 = vpop.eup %1152 }
  0x48   :  { %1122 = vmatpush3.bf16.msra.mxu0 %v1119_v55  ;;  %1138 = vmatpush3.bf16.msra.mxu1 %v1119_v55  ;;  %v962_v55 = vsel %vm379_vm14, 1.0, %v1310_v7  ;;  %v610_v17 = vmul.f32 0.6931472, %v1153_v58 }
  0x49   :  { %v669_v13 = vmul.f32 %v606_v57, %v1366_v4  ;;  %v588_v4 = vadd.f32 1e-15, %v1421_v51 }
  0x4b   :  { %1068 = vmatmul.mubr.f32.vlgmr.msra.gmra.mrb[0].mxu1 %v1429_v56  ;;  %478 = vadd.xlane.f32.xlu1 %v948_v61  ;;  %v961_v61 = vsel %vm378_vm15, 1.0, %v1310_v7 }
  0x4c   :  { %476 = vadd.xlane.f32.xlu0 %v947_v62  ;;  %1044 = vmatmul.mubr.f32.vlgmr.msra.gmra.mrb[0].mxu0 %v1372_v11  ;;  %v584_v62 = vadd.f32 1e-15, %v1405_v37 }
  0x4d   :  { %1046 = vmatprep.mubr.f32.mxu0 %v1363_v2  ;;  %1070 = vmatprep.mubr.f32.mxu1 %v1437_v60 }
  0x4e   :  { %1166 = vlog2.f32 %v584_v62 }
  0x4f   :  { %1071 = vmatmul.mubr.f32.gmra.mrb[2].mxu1 %v1435_v59  ;;  %482 = vadd.xlane.f32.xlu1 %v950_v1  ;;  %v670_v1 = vmul.f32 %v608_v50, %v1372_v11  ;;  %v585_v11 = vadd.f32 1e-15, %v1415_v45 }
  0x50   :  { %480 = vadd.xlane.f32.xlu0 %v949_v3  ;;  %1047 = vmatmul.mubr.f32.gmra.mrb[2].mxu0 %v1370_v10  ;;  %v612_v3 = vmul.f32 0.6931472, %v1151_v54 }
  0x51   :  { %1049 = vmatprep.mubr.f32.mxu0 %v1380_v16  ;;  %1073 = vmatprep.mubr.f32.mxu1 %v1446_v0 }
  0x53   :  { %1074 = vmatmul.mubr.f32.gmra.mrb[4].mxu1 %v1443_v63  ;;  %486 = vadd.xlane.f32.xlu1 %v952_v8  ;;  %v583_v8 = vadd.f32 1e-15, %v1407_v38 }
  0x54   :  { %484 = vadd.xlane.f32.xlu0 %v951_v9  ;;  %1050 = vmatmul.mubr.f32.gmra.mrb[4].mxu0 %v1378_v15  ;;  %v1155_v9 = vpop.eup %1154 }
  0x55   :  { %1052 = vmatprep.mubr.f32.mxu0 %v1388_v23  ;;  %1076 = vmatprep.mubr.f32.mxu1 %v1458_v6  ;;  %v1157_v7 = vpop.eup %1156  ;;  %v616_v21 = vmul.f32 0.6931472, %v1155_v9  ;;  %1168 = vlog2.f32 %v583_v8 }
  0x56   :  { %v1159_v25 = vpop.eup %1158 }
  0x57   :  { %1077 = vmatmul.mubr.f32.gmra.mrb[6].mxu1 %v1455_v5  ;;  %490 = vadd.xlane.f32.xlu1 %v954_v18  ;;  %v586_v18 = vadd.f32 1e-15, %v1413_v44  ;;  %v1161_v32 = vpop.eup %1160  ;;  %v674_v34 = vmul.f32 %v616_v21, %v1378_v15  ;;  %v589_v15 = vadd.f32 1e-15, %v1394_v28 }
  0x58   :  { %488 = vadd.xlane.f32.xlu0 %v953_v19  ;;  %1053 = vmatmul.mubr.f32.gmra.mrb[6].mxu0 %v1386_v22  ;;  %v672_v19 = vmul.f32 %v612_v3, %v1370_v10  ;;  %v587_v10 = vadd.f32 1e-15, %v1423_v52  ;;  %v618_v42 = vmul.f32 0.6931472, %v1161_v32 }
  0x59   :  { %1055 = vmatprep.mubr.f32.mxu0 %v1398_v31  ;;  %1079 = vmatprep.mubr.f32.mxu1 %v1471_v14  ;;  %1170 = vlog2.f32 %v586_v18 }
  0x5a   :  { %1172 = vlog2.f32 %v585_v11  ;;  %v675_v49 = vmul.f32 %v618_v42, %v1388_v23  ;;  %v594_v23 = vadd.f32 1e-15, %v1443_v63 }
  0x5b   :  { %1080 = vmatmul.mubr.f32.gmra.mrb[8].mxu1 %v1467_v12  ;;  %494 = vadd.xlane.f32.xlu1 %v956_v26  ;;  %v671_v26 = vmul.f32 %v610_v17, %v1363_v2  ;;  %1174 = vlog2.f32 %v588_v4  ;;  %v590_v2 = vadd.f32 1e-15, %v1429_v56 }
  0x5c   :  { %492 = vadd.xlane.f32.xlu0 %v955_v27  ;;  %1056 = vmatmul.mubr.f32.gmra.mrb[8].mxu0 %v1396_v30  ;;  %v614_v27 = vmul.f32 0.6931472, %v1157_v7  ;;  %1176 = vlog2.f32 %v587_v10 }
  0x5d   :  { %1058 = vmatprep.mubr.f32.mxu0 %v1407_v38  ;;  %1082 = vmatprep.mubr.f32.mxu1 %v1485_v24  ;;  %1178 = vlog2.f32 %v590_v2 }
  0x5e   :  { %v673_v40 = vmul.f32 %v614_v27, %v1380_v16  ;;  %v592_v16 = vadd.f32 1e-15, %v1435_v59  ;;  %1180 = vlog2.f32 %v589_v15 }
  0x5f   :  { %1083 = vmatmul.mubr.f32.gmra.mrb[10].mxu1 %v1481_v20  ;;  %498 = vadd.xlane.f32.xlu1 %v958_v35  ;;  %v620_v35 = vmul.f32 0.6931472, %v1159_v25 }
  0x60   :  { %496 = vadd.xlane.f32.xlu0 %v957_v36  ;;  %1059 = vmatmul.mubr.f32.gmra.mrb[10].mxu0 %v1405_v37  ;;  %v1163_v36 = vpop.eup %1162  ;;  %1182 = vlog2.f32 %v592_v16 }
  0x61   :  { %1061 = vmatprep.mubr.f32.mxu0 %v1415_v45  ;;  %1085 = vmatprep.mubr.f32.mxu1 %v1499_v33  ;;  %v1165_v43 = vpop.eup %1164  ;;  %v624_v47 = vmul.f32 0.6931472, %v1163_v36 }
  0x62   :  { %v622_v50 = vmul.f32 0.6931472, %v1165_v43 }
  0x63   :  { %1086 = vmatmul.mubr.f32.gmra.mrb[12].mxu1 %v1495_v29  ;;  %502 = vadd.xlane.f32.xlu1 %v960_v46  ;;  %v676_v46 = vmul.f32 %v620_v35, %v1386_v22  ;;  %v678_v54 = vmul.f32 %v624_v47, %v1396_v30  ;;  %v591_v22 = vadd.f32 1e-15, %v1437_v60  ;;  %v593_v30 = vadd.f32 1e-15, %v1446_v0 }
  0x64   :  { %500 = vadd.xlane.f32.xlu0 %v959_v48  ;;  %1062 = vmatmul.mubr.f32.gmra.mrb[12].mxu0 %v1413_v44  ;;  %v1167_v48 = vpop.eup %1166  ;;  %v677_v58 = vmul.f32 %v622_v50, %v1398_v31  ;;  %v596_v31 = vadd.f32 1e-15, %v1455_v5 }
  0x65   :  { %1064 = vmatprep.mubr.f32.mxu0 %v1423_v52  ;;  %1088 = vmatprep.mubr.f32.mxu1 %v1513_v41  ;;  %v1169_v53 = vpop.eup %1168  ;;  %1184 = vlog2.f32 %v591_v22 }
  0x66   :  { %v1171_v57 = vpop.eup %1170  ;;  %1186 = vlog2.f32 %v594_v23 }
  0x67   :  { %1089 = vmatmul.mubr.f32.gmra.mrb[14].mxu1 %v1509_v39  ;;  %506 = vadd.xlane.f32.xlu1 %v962_v55  ;;  %v628_v55 = vmul.f32 0.6931472, %v1167_v48  ;;  %v1173_v62 = vpop.eup %1172  ;;  %v632_v3 = vmul.f32 0.6931472, %v1171_v57  ;;  %1188 = vlog2.f32 %v593_v30 }
  0x68   :  { %504 = vadd.xlane.f32.xlu0 %v961_v61  ;;  %1065 = vmatmul.mubr.f32.gmra.mrb[14].mxu0 %v1421_v51  ;;  %v626_v61 = vmul.f32 0.6931472, %v1169_v53  ;;  %v1175_v8 = vpop.eup %1174  ;;  %1190 = vlog2.f32 %v596_v31 }
  0x69   :  { %v1177_v17 = vpop.eup %1176  ;;  %v682_v7 = vmul.f32 %v632_v3, %v1413_v44  ;;  %v636_v18 = vmul.f32 0.6931472, %v1175_v8  ;;  %v597_v44 = vadd.f32 1e-15, %v1471_v14 }
  0x6a   :  { %v679_v9 = vmul.f32 %v626_v61, %v1407_v38  ;;  %v634_v11 = vmul.f32 0.6931472, %v1177_v17  ;;  %v598_v38 = vadd.f32 1e-15, %v1467_v12 }
  0x6b   :  { %703 = vadd.xlane.f32.xlu1 %v670_v1  ;;  %v680_v1 = vmul.f32 %v628_v55, %v1405_v37  ;;  %v595_v37 = vadd.f32 1e-15, %v1458_v6 }
  0x6c   :  { %701 = vadd.xlane.f32.xlu0 %v669_v13  ;;  %v630_v13 = vmul.f32 0.6931472, %v1173_v62  ;;  %v683_v4 = vmul.f32 %v634_v11, %v1423_v52  ;;  %v602_v52 = vadd.f32 1e-15, %v1495_v29 }
  0x6d   :  { %1192 = vlog2.f32 %v595_v37 }
  0x6e   :  { %v681_v21 = vmul.f32 %v630_v13, %v1415_v45  ;;  %1194 = vlog2.f32 %v598_v38  ;;  %v600_v45 = vadd.f32 1e-15, %v1481_v20 }
  0x6f   :  { %707 = vadd.xlane.f32.xlu1 %v672_v19  ;;  %v1179_v19 = vpop.eup %1178  ;;  %1196 = vlog2.f32 %v597_v44 }
  0x70   :  { %705 = vadd.xlane.f32.xlu0 %v671_v26  ;;  %v1181_v25 = vpop.eup %1180  ;;  %v684_v26 = vmul.f32 %v636_v18, %v1421_v51  ;;  %v640_v27 = vmul.f32 0.6931472, %v1179_v19  ;;  %v599_v51 = vadd.f32 1e-15, %v1485_v24  ;;  %1198 = vlog2.f32 %v600_v45 }
  0x71   :  { %v1183_v32 = vpop.eup %1182 }
  0x72   :  { %v1185_v35 = vpop.eup %1184  ;;  %v686_v10 = vmul.f32 %v640_v27, %v1429_v56  ;;  %v644_v36 = vmul.f32 0.6931472, %v1183_v32  ;;  %1200 = vlog2.f32 %v599_v51  ;;  %v601_v56 = vadd.f32 1e-15, %v1499_v33 }
  0x73   :  { %711 = vadd.xlane.f32.xlu1 %v674_v34  ;;  %v638_v34 = vmul.f32 0.6931472, %v1181_v25  ;;  %v642_v43 = vmul.f32 0.6931472, %v1185_v35  ;;  %1202 = vlog2.f32 %v602_v52 }
  0x74   :  { %709 = vadd.xlane.f32.xlu0 %v673_v40  ;;  %v1187_v40 = vpop.eup %1186  ;;  %1204 = vlog2.f32 %v601_v56 }
  0x75   :  { %v685_v42 = vmul.f32 %v638_v34, %v1394_v28  ;;  %v1189_v2 = vpop.eup %1188  ;;  %v648_v47 = vmul.f32 0.6931472, %v1187_v40  ;;  %v687_v48 = vmul.f32 %v642_v43, %v1437_v60  ;;  %v604_v28 = vadd.f32 1e-15, %v1509_v39 }
  0x76   :  { %v1191_v15 = vpop.eup %1190 }
  0x77   :  { %715 = vadd.xlane.f32.xlu1 %v676_v46  ;;  %v688_v46 = vmul.f32 %v644_v36, %v1435_v59  ;;  %v1193_v50 = vpop.eup %1192  ;;  %v690_v53 = vmul.f32 %v648_v47, %v1443_v63  ;;  %v652_v16 = vmul.f32 0.6931472, %v1191_v15  ;;  %v603_v59 = vadd.f32 1e-15, %v1513_v41 }
  0x78   :  { %713 = vadd.xlane.f32.xlu0 %v675_v49  ;;  %v646_v49 = vmul.f32 0.6931472, %v1189_v2  ;;  %v650_v22 = vmul.f32 0.6931472, %v1193_v50  ;;  %1206 = vlog2.f32 %v604_v28 }
  0x79   :  { %v692_v60 = vmul.f32 %v652_v16, %v1455_v5  ;;  %1208 = vlog2.f32 %v603_v59 }
  0x7a   :  { %v689_v55 = vmul.f32 %v646_v49, %v1446_v0  ;;  %v691_v63 = vmul.f32 %v650_v22, %v1458_v6 }
  0x7b   :  { %719 = vadd.xlane.f32.xlu1 %v678_v54  ;;  %v1195_v54 = vpop.eup %1194 }
  0x7c   :  { %717 = vadd.xlane.f32.xlu0 %v677_v58  ;;  %v1197_v57 = vpop.eup %1196  ;;  %v656_v58 = vmul.f32 0.6931472, %v1195_v54 }
  0x7d   :  { %v1199_v61 = vpop.eup %1198  ;;  %v654_v62 = vmul.f32 0.6931472, %v1197_v57 }
  0x7e   :  { %v1201_v23 = vpop.eup %1200  ;;  %v660_v3 = vmul.f32 0.6931472, %v1199_v61 }
  0x7f   :  { %723 = vadd.xlane.f32.xlu1 %v680_v1  ;;  %v694_v1 = vmul.f32 %v656_v58, %v1467_v12  ;;  %v1203_v30 = vpop.eup %1202  ;;  %v693_v0 = vmul.f32 %v654_v62, %v1471_v14  ;;  %v658_v8 = vmul.f32 0.6931472, %v1201_v23 }
  0x80   :  { %721 = vadd.xlane.f32.xlu0 %v679_v9  ;;  %v1205_v9 = vpop.eup %1204  ;;  %v696_v5 = vmul.f32 %v660_v3, %v1481_v20  ;;  %v664_v13 = vmul.f32 0.6931472, %v1203_v30 }
  0x81   :  { %v695_v6 = vmul.f32 %v658_v8, %v1485_v24  ;;  %v662_v31 = vmul.f32 0.6931472, %v1205_v9 }
  0x82   :  { %v1207_v17 = vpop.eup %1206  ;;  %v698_v12 = vmul.f32 %v664_v13, %v1495_v29 }
  0x83   :  { %727 = vadd.xlane.f32.xlu1 %v682_v7  ;;  %v1209_v7 = vpop.eup %1208  ;;  %v668_v18 = vmul.f32 0.6931472, %v1207_v17  ;;  %v697_v37 = vmul.f32 %v662_v31, %v1499_v33 }
  0x84   :  { %725 = vadd.xlane.f32.xlu0 %v681_v21  ;;  %v666_v14 = vmul.f32 0.6931472, %v1209_v7 }
  0x85   :  { %v700_v19 = vmul.f32 %v668_v18, %v1509_v39 }
  0x86   :  { %v699_v20 = vmul.f32 %v666_v14, %v1513_v41 }
  0x87   :  { %731 = vadd.xlane.f32.xlu1 %v684_v26 }
  0x88   :  { %729 = vadd.xlane.f32.xlu0 %v683_v4 }
  0x8b   :  { %735 = vadd.xlane.f32.xlu1 %v686_v10 }
  0x8c   :  { %733 = vadd.xlane.f32.xlu0 %v685_v42 }
  0x8f   :  { %739 = vadd.xlane.f32.xlu1 %v688_v46 }
  0x90   :  { %737 = vadd.xlane.f32.xlu0 %v687_v48  ;;  %v797_v48 = vlaneseq }
  0x92   :  { %v1639_v28 = vand.u32 127, %v797_v48 }
  0x93   :  { %743 = vadd.xlane.f32.xlu1 %v690_v53 }
  0x94   :  { %741 = vadd.xlane.f32.xlu0 %v689_v55  ;;  %vm800_vm0 = vcmp.eq.s32.totalorder %v1639_v28, 1  ;;  %vm799_vm1 = vcmp.eq.s32.totalorder %v1639_v28, 0 }
  0x97   :  { %747 = vadd.xlane.f32.xlu1 %v692_v60 }
  0x98   :  { %745 = vadd.xlane.f32.xlu0 %v691_v63 }
  0x9b   :  { %751 = vadd.xlane.f32.xlu1 %v694_v1 }
  0x9c   :  { %749 = vadd.xlane.f32.xlu0 %v693_v0 }
  0x9f   :  { %755 = vadd.xlane.f32.xlu1 %v696_v5 }
  0xa0   :  { %753 = vadd.xlane.f32.xlu0 %v695_v6 }
  0xa3   :  { %759 = vadd.xlane.f32.xlu1 %v698_v12 }
  0xa4   :  { %757 = vadd.xlane.f32.xlu0 %v697_v37 }
  0xa7   :  { %763 = vadd.xlane.f32.xlu1 %v700_v19 }
  0xa8   :  { %761 = vadd.xlane.f32.xlu0 %v699_v20 }
  0xb8   :  { %v449_v21 = vpop.xlane.xlu1 %448  ;;  %v445_v24 = vpop.xlane.xlu0 %444 }
  0xb9   :  { %v509_v59 = vmul.f32 0.125, %v445_v24  ;;  %v511_v61 = vmul.f32 0.125, %v449_v21 }
  0xbb   :  { %v541_v63 = vsub.f32 1.0, %v509_v59  ;;  %v543_v17 = vsub.f32 1.0, %v511_v61 }
  0xbc   :  { %v451_v11 = vpop.xlane.xlu1 %450  ;;  %v447_v25 = vpop.xlane.xlu0 %446 }
  0xbd   :  { %v510_v16 = vmul.f32 0.125, %v447_v25  ;;  %v512_v57 = vmul.f32 0.125, %v451_v11 }
  0xbf   :  { %v542_v60 = vsub.f32 1.0, %v510_v16  ;;  %v544_v9 = vsub.f32 1.0, %v512_v57 }
  0xc0   :  { %v455_v38 = vpop.xlane.xlu1 %454  ;;  %v453_v26 = vpop.xlane.xlu0 %452 }
  0xc1   :  { %v514_v5 = vmul.f32 0.125, %v455_v38  ;;  %v513_v6 = vmul.f32 0.125, %v453_v26 }
  0xc3   :  { %v546_v20 = vsub.f32 1.0, %v514_v5  ;;  %v545_v11 = vsub.f32 1.0, %v513_v6 }
  0xc4   :  { %v459_v29 = vpop.xlane.xlu1 %458  ;;  %v1591_v27 = vpop.xlane.xlu0 %456 }
  0xc5   :  { %v516_v21 = vmul.f32 0.125, %v459_v29  ;;  %v515_v25 = vmul.f32 0.125, %v1591_v27 }
  0xc7   :  { %v547_v57 = vsub.f32 1.0, %v515_v25 }
  0xc8   :  { %v1593_v44 = vpop.xlane.xlu1 %462  ;;  %v1595_v33 = vpop.xlane.xlu0 %460 }
  0xcc   :  { %v1597_v32 = vpop.xlane.xlu1 %466  ;;  %v1599_v39 = vpop.xlane.xlu0 %464 }
  0xd0   :  { %v1601_v41 = vpop.xlane.xlu1 %470  ;;  %v1603_v4 = vpop.xlane.xlu0 %468 }
  0xd4   :  { %v1605_v34 = vpop.xlane.xlu1 %474  ;;  %v1607_v35 = vpop.xlane.xlu0 %472 }
  0xd8   :  { %v1609_v45 = vpop.xlane.xlu1 %478 }
  0xd9   :  { %v1611_v10 = vpop.xlane.xlu0 %476 }
  0xdc   :  { %v1613_v36 = vpop.xlane.xlu1 %482 }
  0xdd   :  { %v1615_v51 = vpop.xlane.xlu0 %480 }
  0xe0   :  { %v1617_v40 = vpop.xlane.xlu1 %486 }
  0xe1   :  { %v1619_v42 = vpop.xlane.xlu0 %484 }
  0xe4   :  { %v1621_v43 = vpop.xlane.xlu1 %490 }
  0xe5   :  { %v1623_v2 = vpop.xlane.xlu0 %488 }
  0xe8   :  { %v1625_v52 = vpop.xlane.xlu1 %494 }
  0xe9   :  { %v1627_v46 = vpop.xlane.xlu0 %492 }
  0xec   :  { %v1629_v47 = vpop.xlane.xlu1 %498 }
  0xed   :  { %v1631_v56 = vpop.xlane.xlu0 %496 }
  0xf0   :  { %v1633_v15 = vpop.xlane.xlu1 %502 }
  0xf1   :  { %v1635_v49 = vpop.xlane.xlu0 %500 }
  0xf4   :  { %v1637_v50 = vpop.xlane.xlu1 %506 }
  0xf5   :  { %v1641_v53 = vpop.xlane.xlu0 %504 }
  0xf8   :  { %v704_v54 = vpop.xlane.xlu1 %703 }
  0xf9   :  { %v766_v55 = vsub.f32 0.0, %v704_v54  ;;  %v702_v22 = vpop.xlane.xlu0 %701 }
  0xfa   :  { %v765_v58 = vsub.f32 0.0, %v702_v22  ;;  %v518_v22 = vmul.f32 0.125, %v1593_v44 }
  0xfb   :  { %v802_v62 = vsel %vm800_vm0, %v766_v55, 0.0  ;;  %v548_v55 = vsub.f32 1.0, %v516_v21 }
  0xfc   :  { %v834_v23 = vsel %vm799_vm1, %v542_v60, %v802_v62  ;;  %v801_v1 = vsel %vm800_vm0, %v765_v58, 0.0  ;;  %v708_v3 = vpop.xlane.xlu1 %707  ;;  %v517_v60 = vmul.f32 0.125, %v1595_v33 }
  0xfd   :  { %866 = vst [vmem:[#allocation8 + $0x8] sm:$0xff] %v834_v23  ;;  %v833_v30 = vsel %vm799_vm1, %v541_v63, %v801_v1  ;;  %v768_v0 = vsub.f32 0.0, %v708_v3  ;;  %v706_v8 = vpop.xlane.xlu0 %705  ;;  %v550_v3 = vsub.f32 1.0, %v518_v22 }
  0xfe   :  { %865 = vst [vmem:[#allocation8] sm:$0xff] %v833_v30  ;;  %v767_v13 = vsub.f32 0.0, %v706_v8  ;;  %v520_v30 = vmul.f32 0.125, %v1597_v32  ;;  %v519_v8 = vmul.f32 0.125, %v1599_v39 }
  0xff   :  { %v804_v31 = vsel %vm800_vm0, %v768_v0, 0.0  ;;  %v549_v0 = vsub.f32 1.0, %v517_v60 }
 0x100   :  { %v836_v7 = vsel %vm799_vm1, %v544_v9, %v804_v31  ;;  %v803_v12 = vsel %vm800_vm0, %v767_v13, 0.0  ;;  %v712_v18 = vpop.xlane.xlu1 %711 }
 0x101   :  { %868 = vst [vmem:[#allocation8 + $0x18] sm:$0xff] %v836_v7  ;;  %v835_v37 = vsel %vm799_vm1, %v543_v17, %v803_v12  ;;  %v770_v14 = vsub.f32 0.0, %v712_v18  ;;  %v710_v19 = vpop.xlane.xlu0 %709  ;;  %v552_v7 = vsub.f32 1.0, %v520_v30  ;;  %v522_v12 = vmul.f32 0.125, %v1601_v41 }
 0x102   :  { %867 = vst [vmem:[#allocation8 + $0x10] sm:$0xff] %v835_v37  ;;  %v769_v24 = vsub.f32 0.0, %v710_v19  ;;  %v551_v18 = vsub.f32 1.0, %v519_v8  ;;  %v521_v37 = vmul.f32 0.125, %v1603_v4  ;;  %v528_v30 = vmul.f32 0.125, %v1613_v36 }
 0x103   :  { %v806_v38 = vsel %vm800_vm0, %v770_v14, 0.0  ;;  %v554_v25 = vsub.f32 1.0, %v522_v12 }
 0x104   :  { %v838_v26 = vsel %vm799_vm1, %v546_v20, %v806_v38  ;;  %v805_v48 = vsel %vm800_vm0, %v769_v24, 0.0  ;;  %v716_v16 = vpop.xlane.xlu1 %715  ;;  %v524_v38 = vmul.f32 0.125, %v1605_v34 }
 0x105   :  { %870 = vst [vmem:[#allocation8 + $0x28] sm:$0xff] %v838_v26  ;;  %v837_v59 = vsel %vm799_vm1, %v545_v11, %v805_v48  ;;  %v772_v29 = vsub.f32 0.0, %v716_v16  ;;  %v714_v54 = vpop.xlane.xlu0 %713  ;;  %v553_v26 = vsub.f32 1.0, %v521_v37  ;;  %v523_v48 = vmul.f32 0.125, %v1607_v35 }
 0x106   :  { %869 = vst [vmem:[#allocation8 + $0x20] sm:$0xff] %v837_v59  ;;  %v771_v27 = vsub.f32 0.0, %v714_v54 }
 0x107   :  { %v808_v58 = vsel %vm800_vm0, %v772_v29, 0.0  ;;  %v555_v60 = vsub.f32 1.0, %v523_v48  ;;  %v531_v48 = vmul.f32 0.125, %v1623_v2 }
 0x108   :  { %v840_v61 = vsel %vm799_vm1, %v548_v55, %v808_v58  ;;  %v807_v63 = vsel %vm800_vm0, %v771_v27, 0.0  ;;  %v720_v62 = vpop.xlane.xlu1 %719  ;;  %v556_v27 = vsub.f32 1.0, %v524_v38  ;;  %v525_v58 = vmul.f32 0.125, %v1611_v10 }
 0x109   :  { %872 = vst [vmem:[#allocation8 + $0x38] sm:$0xff] %v840_v61  ;;  %v839_v23 = vsel %vm799_vm1, %v547_v57, %v807_v63  ;;  %v774_v44 = vsub.f32 0.0, %v720_v62  ;;  %v718_v1 = vpop.xlane.xlu0 %717  ;;  %v526_v57 = vmul.f32 0.125, %v1609_v45 }
 0x10a   :  { %871 = vst [vmem:[#allocation8 + $0x30] sm:$0xff] %v839_v23  ;;  %v773_v33 = vsub.f32 0.0, %v718_v1 }
 0x10b   :  { %v810_v9 = vsel %vm800_vm0, %v774_v44, 0.0 }
 0x10c   :  { %v842_v5 = vsel %vm799_vm1, %v550_v3, %v810_v9  ;;  %v809_v13 = vsel %vm800_vm0, %v773_v33, 0.0  ;;  %v724_v17 = vpop.xlane.xlu1 %723  ;;  %v558_v3 = vsub.f32 1.0, %v526_v57  ;;  %v557_v33 = vsub.f32 1.0, %v525_v58 }
 0x10d   :  { %874 = vst [vmem:[#allocation8 + $0x48] sm:$0xff] %v842_v5  ;;  %v841_v6 = vsel %vm799_vm1, %v549_v0, %v809_v13  ;;  %v776_v32 = vsub.f32 0.0, %v724_v17  ;;  %v722_v31 = vpop.xlane.xlu0 %721  ;;  %v527_v0 = vmul.f32 0.125, %v1615_v51 }
 0x10e   :  { %873 = vst [vmem:[#allocation8 + $0x40] sm:$0xff] %v841_v6  ;;  %v775_v39 = vsub.f32 0.0, %v722_v31  ;;  %v530_v31 = vmul.f32 0.125, %v1617_v40 }
 0x10f   :  { %v812_v14 = vsel %vm800_vm0, %v776_v32, 0.0  ;;  %v560_v32 = vsub.f32 1.0, %v528_v30  ;;  %v559_v12 = vsub.f32 1.0, %v527_v0  ;;  %v536_v0 = vmul.f32 0.125, %v1629_v47 }
 0x110   :  { %v844_v19 = vsel %vm799_vm1, %v552_v7, %v812_v14  ;;  %v811_v20 = vsel %vm800_vm0, %v775_v39, 0.0  ;;  %v728_v21 = vpop.xlane.xlu1 %727  ;;  %v529_v39 = vmul.f32 0.125, %v1619_v42 }
 0x111   :  { %876 = vst [vmem:[#allocation8 + $0x58] sm:$0xff] %v844_v19  ;;  %v843_v24 = vsel %vm799_vm1, %v551_v18, %v811_v20  ;;  %v778_v41 = vsub.f32 0.0, %v728_v21  ;;  %v726_v11 = vpop.xlane.xlu0 %725 }
 0x112   :  { %875 = vst [vmem:[#allocation8 + $0x50] sm:$0xff] %v843_v24  ;;  %v777_v4 = vsub.f32 0.0, %v726_v11  ;;  %v562_v11 = vsub.f32 1.0, %v530_v31 }
 0x113   :  { %v814_v16 = vsel %vm800_vm0, %v778_v41, 0.0 }
 0x114   :  { %v846_v59 = vsel %vm799_vm1, %v554_v25, %v814_v16  ;;  %v813_v29 = vsel %vm800_vm0, %v777_v4, 0.0  ;;  %v732_v54 = vpop.xlane.xlu1 %731  ;;  %v532_v25 = vmul.f32 0.125, %v1621_v43 }
 0x115   :  { %878 = vst [vmem:[#allocation8 + $0x68] sm:$0xff] %v846_v59  ;;  %v845_v55 = vsel %vm799_vm1, %v553_v26, %v813_v29  ;;  %v780_v34 = vsub.f32 0.0, %v732_v54  ;;  %v730_v22 = vpop.xlane.xlu0 %729  ;;  %v561_v26 = vsub.f32 1.0, %v529_v39  ;;  %v568_v39 = vsub.f32 1.0, %v536_v0 }
 0x116   :  { %877 = vst [vmem:[#allocation8 + $0x60] sm:$0xff] %v845_v55  ;;  %v779_v35 = vsub.f32 0.0, %v730_v22  ;;  %v564_v57 = vsub.f32 1.0, %v532_v25 }
 0x117   :  { %v816_v61 = vsel %vm800_vm0, %v780_v34, 0.0 }
 0x118   :  { %v848_v63 = vsel %vm799_vm1, %v556_v27, %v816_v61  ;;  %v815_v62 = vsel %vm800_vm0, %v779_v35, 0.0  ;;  %v736_v23 = vpop.xlane.xlu1 %735  ;;  %v534_v35 = vmul.f32 0.125, %v1625_v52  ;;  %v563_v61 = vsub.f32 1.0, %v531_v48 }
 0x119   :  { %880 = vst [vmem:[#allocation8 + $0x78] sm:$0xff] %v848_v63  ;;  %v847_v44 = vsel %vm799_vm1, %v555_v60, %v815_v62  ;;  %v782_v45 = vsub.f32 0.0, %v736_v23  ;;  %v734_v1 = vpop.xlane.xlu0 %733  ;;  %v533_v63 = vmul.f32 0.125, %v1627_v46 }
 0x11a   :  { %879 = vst [vmem:[#allocation8 + $0x70] sm:$0xff] %v847_v44  ;;  %v781_v10 = vsub.f32 0.0, %v734_v1 }
 0x11b   :  { %v818_v8 = vsel %vm800_vm0, %v782_v45, 0.0 }
 0x11c   :  { %v850_v9 = vsel %vm799_vm1, %v558_v3, %v818_v8  ;;  %v817_v5 = vsel %vm800_vm0, %v781_v10, 0.0  ;;  %v740_v13 = vpop.xlane.xlu1 %739 }
 0x11d   :  { %882 = vst [vmem:[#allocation8 + $0x88] sm:$0xff] %v850_v9  ;;  %v849_v17 = vsel %vm799_vm1, %v557_v33, %v817_v5  ;;  %v784_v36 = vsub.f32 0.0, %v740_v13  ;;  %v738_v6 = vpop.xlane.xlu0 %737  ;;  %v566_v33 = vsub.f32 1.0, %v534_v35  ;;  %v565_v5 = vsub.f32 1.0, %v533_v63 }
 0x11e   :  { %881 = vst [vmem:[#allocation8 + $0x80] sm:$0xff] %v849_v17  ;;  %v783_v51 = vsub.f32 0.0, %v738_v6  ;;  %v1069_v7 = vpop.f32.mrb[0].mxu1  ;;  %v535_v13 = vmul.f32 0.125, %v1631_v56 }
 0x11f   :  { %v820_v18 = vsel %vm800_vm0, %v784_v36, 0.0  ;;  %v1045_v37 = vpop.f32.mrb[0].mxu0  ;;  %333 = vst [vmem:[#allocation7 + $0x88] sm:$0xff] %v1069_v7  ;;  %v237_v14 = vpop.f32.mrb[1].mxu1 }
 0x120   :  { %v852_v19 = vsel %vm799_vm1, %v560_v32, %v820_v18  ;;  %v819_v20 = vsel %vm800_vm0, %v783_v51, 0.0  ;;  %317 = vst [vmem:[#allocation7 + $0x8] sm:$0xff] %v1045_v37  ;;  %v157_v40 = vpop.f32.mrb[1].mxu0  ;;  %332 = vst [vmem:[#allocation7 + $0x80] sm:$0xff] %v237_v14  ;;  %v744_v21 = vpop.xlane.xlu1 %743  ;;  %v538_v18 = vmul.f32 0.125, %v1633_v15 }
 0x121   :  { %884 = vst [vmem:[#allocation8 + $0x98] sm:$0xff] %v852_v19  ;;  %v851_v42 = vsel %vm799_vm1, %v559_v12, %v819_v20  ;;  %316 = vst [vmem:[#allocation7] sm:$0xff] %v157_v40  ;;  %v786_v24 = vsub.f32 0.0, %v744_v21  ;;  %v742_v41 = vpop.xlane.xlu0 %741  ;;  %v567_v19 = vsub.f32 1.0, %v535_v13  ;;  %v537_v20 = vmul.f32 0.125, %v1635_v49 }
 0x122   :  { %883 = vst [vmem:[#allocation8 + $0x90] sm:$0xff] %v851_v42  ;;  %v785_v38 = vsub.f32 0.0, %v742_v41  ;;  %v1072_v4 = vpop.f32.mrb[2].mxu1 }
 0x123   :  { %v822_v16 = vsel %vm800_vm0, %v786_v24, 0.0  ;;  %v1048_v59 = vpop.f32.mrb[2].mxu0  ;;  %335 = vst [vmem:[#allocation7 + $0x98] sm:$0xff] %v1072_v4  ;;  %v247_v29 = vpop.f32.mrb[3].mxu1  ;;  %v570_v4 = vsub.f32 1.0, %v538_v18 }
 0x124   :  { %v854_v54 = vsel %vm799_vm1, %v562_v11, %v822_v16  ;;  %v821_v55 = vsel %vm800_vm0, %v785_v38, 0.0  ;;  %319 = vst [vmem:[#allocation7 + $0x18] sm:$0xff] %v1048_v59  ;;  %v167_v43 = vpop.f32.mrb[3].mxu0  ;;  %334 = vst [vmem:[#allocation7 + $0x90] sm:$0xff] %v247_v29  ;;  %v748_v34 = vpop.xlane.xlu1 %747  ;;  %v569_v59 = vsub.f32 1.0, %v537_v20  ;;  %v539_v29 = vmul.f32 0.125, %v1641_v53 }
 0x125   :  { %886 = vst [vmem:[#allocation8 + $0xa8] sm:$0xff] %v854_v54  ;;  %v853_v2 = vsel %vm799_vm1, %v561_v26, %v821_v55  ;;  %318 = vst [vmem:[#allocation7 + $0x10] sm:$0xff] %v167_v43  ;;  %v788_v22 = vsub.f32 0.0, %v748_v34  ;;  %v746_v27 = vpop.xlane.xlu0 %745  ;;  %v540_v26 = vmul.f32 0.125, %v1637_v50 }
 0x126   :  { %885 = vst [vmem:[#allocation8 + $0xa0] sm:$0xff] %v853_v2  ;;  %v787_v60 = vsub.f32 0.0, %v746_v27  ;;  %v1075_v58 = vpop.f32.mrb[4].mxu1 }
 0x127   :  { %v824_v62 = vsel %vm800_vm0, %v788_v22, 0.0  ;;  %v1051_v23 = vpop.f32.mrb[4].mxu0  ;;  %337 = vst [vmem:[#allocation7 + $0xa8] sm:$0xff] %v1075_v58  ;;  %v257_v44 = vpop.f32.mrb[5].mxu1  ;;  %v572_v35 = vsub.f32 1.0, %v540_v26 }
 0x128   :  { %v856_v45 = vsel %vm799_vm1, %v564_v57, %v824_v62  ;;  %v823_v1 = vsel %vm800_vm0, %v787_v60, 0.0  ;;  %321 = vst [vmem:[#allocation7 + $0x28] sm:$0xff] %v1051_v23  ;;  %v177_v52 = vpop.f32.mrb[5].mxu0  ;;  %336 = vst [vmem:[#allocation7 + $0xa0] sm:$0xff] %v257_v44  ;;  %v752_v3 = vpop.xlane.xlu1 %751 }
 0x129   :  { %888 = vst [vmem:[#allocation8 + $0xb8] sm:$0xff] %v856_v45  ;;  %v855_v46 = vsel %vm799_vm1, %v563_v61, %v823_v1  ;;  %320 = vst [vmem:[#allocation7 + $0x20] sm:$0xff] %v177_v52  ;;  %v790_v30 = vsub.f32 0.0, %v752_v3  ;;  %v750_v10 = vpop.xlane.xlu0 %749  ;;  %v571_v61 = vsub.f32 1.0, %v539_v29 }
 0x12a   :  { %887 = vst [vmem:[#allocation8 + $0xb0] sm:$0xff] %v855_v46  ;;  %v789_v8 = vsub.f32 0.0, %v750_v10  ;;  %v1078_v9 = vpop.f32.mrb[6].mxu1 }
 0x12b   :  { %v826_v17 = vsel %vm800_vm0, %v790_v30, 0.0  ;;  %v1054_v36 = vpop.f32.mrb[6].mxu0  ;;  %339 = vst [vmem:[#allocation7 + $0xb8] sm:$0xff] %v1078_v9  ;;  %v267_v6 = vpop.f32.mrb[7].mxu1 }
 0x12c   :  { %v858_v32 = vsel %vm799_vm1, %v566_v33, %v826_v17  ;;  %v825_v31 = vsel %vm800_vm0, %v789_v8, 0.0  ;;  %323 = vst [vmem:[#allocation7 + $0x38] sm:$0xff] %v1054_v36  ;;  %v187_v47 = vpop.f32.mrb[7].mxu0  ;;  %338 = vst [vmem:[#allocation7 + $0xb0] sm:$0xff] %v267_v6  ;;  %v756_v51 = vpop.xlane.xlu1 %755 }
 0x12d   :  { %890 = vst [vmem:[#allocation8 + $0xc8] sm:$0xff] %v858_v32  ;;  %v857_v56 = vsel %vm799_vm1, %v565_v5, %v825_v31  ;;  %322 = vst [vmem:[#allocation7 + $0x30] sm:$0xff] %v187_v47  ;;  %v792_v7 = vsub.f32 0.0, %v756_v51  ;;  %v754_v12 = vpop.xlane.xlu0 %753 }
 0x12e   :  { %889 = vst [vmem:[#allocation8 + $0xc0] sm:$0xff] %v857_v56  ;;  %v791_v37 = vsub.f32 0.0, %v754_v12  ;;  %v1081_v14 = vpop.f32.mrb[8].mxu1 }
 0x12f   :  { %v828_v40 = vsel %vm800_vm0, %v792_v7, 0.0  ;;  %v1057_v21 = vpop.f32.mrb[8].mxu0  ;;  %341 = vst [vmem:[#allocation7 + $0xc8] sm:$0xff] %v1081_v14  ;;  %v277_v42 = vpop.f32.mrb[9].mxu1 }
 0x130   :  { %v860_v24 = vsel %vm799_vm1, %v568_v39, %v828_v40  ;;  %v827_v41 = vsel %vm800_vm0, %v791_v37, 0.0  ;;  %325 = vst [vmem:[#allocation7 + $0x48] sm:$0xff] %v1057_v21  ;;  %v197_v15 = vpop.f32.mrb[9].mxu0  ;;  %340 = vst [vmem:[#allocation7 + $0xc0] sm:$0xff] %v277_v42  ;;  %v760_v11 = vpop.xlane.xlu1 %759 }
 0x131   :  { %892 = vst [vmem:[#allocation8 + $0xd8] sm:$0xff] %v860_v24  ;;  %v859_v49 = vsel %vm799_vm1, %v567_v19, %v827_v41  ;;  %324 = vst [vmem:[#allocation7 + $0x40] sm:$0xff] %v197_v15  ;;  %v794_v25 = vsub.f32 0.0, %v760_v11  ;;  %v758_v38 = vpop.xlane.xlu0 %757 }
 0x132   :  { %891 = vst [vmem:[#allocation8 + $0xd0] sm:$0xff] %v859_v49  ;;  %v793_v48 = vsub.f32 0.0, %v758_v38  ;;  %v1084_v16 = vpop.f32.mrb[10].mxu1 }
 0x133   :  { %v830_v54 = vsel %vm800_vm0, %v794_v25, 0.0  ;;  %v1060_v55 = vpop.f32.mrb[10].mxu0  ;;  %343 = vst [vmem:[#allocation7 + $0xd8] sm:$0xff] %v1084_v16  ;;  %v287_v43 = vpop.f32.mrb[11].mxu1 }
 0x134   :  { %v862_v34 = vsel %vm799_vm1, %v570_v4, %v830_v54  ;;  %v829_v2 = vsel %vm800_vm0, %v793_v48, 0.0  ;;  %327 = vst [vmem:[#allocation7 + $0x58] sm:$0xff] %v1060_v55  ;;  %v207_v50 = vpop.f32.mrb[11].mxu0  ;;  %342 = vst [vmem:[#allocation7 + $0xd0] sm:$0xff] %v287_v43  ;;  %v764_v22 = vpop.xlane.xlu1 %763 }
 0x135   :  { %894 = vst [vmem:[#allocation8 + $0xe8] sm:$0xff] %v862_v34  ;;  %v861_v53 = vsel %vm799_vm1, %v569_v59, %v829_v2  ;;  %326 = vst [vmem:[#allocation7 + $0x50] sm:$0xff] %v207_v50  ;;  %v796_v27 = vsub.f32 0.0, %v764_v22  ;;  %v762_v57 = vpop.xlane.xlu0 %761 }
 0x136   :  { %893 = vst [vmem:[#allocation8 + $0xe0] sm:$0xff] %v861_v53  ;;  %v795_v60 = vsub.f32 0.0, %v762_v57  ;;  %v1087_v58 = vpop.f32.mrb[12].mxu1 }
 0x137   :  { %v832_v63 = vsel %vm800_vm0, %v796_v27, 0.0  ;;  %v1063_v62 = vpop.f32.mrb[12].mxu0  ;;  %345 = vst [vmem:[#allocation7 + $0xe8] sm:$0xff] %v1087_v58  ;;  %v297_v23 = vpop.f32.mrb[13].mxu1 }
 0x138   :  { %v864_v44 = vsel %vm799_vm1, %v572_v35, %v832_v63  ;;  %v831_v45 = vsel %vm800_vm0, %v795_v60, 0.0  ;;  %329 = vst [vmem:[#allocation7 + $0x68] sm:$0xff] %v1063_v62  ;;  %v217_v1 = vpop.f32.mrb[13].mxu0  ;;  %344 = vst [vmem:[#allocation7 + $0xe0] sm:$0xff] %v297_v23 }
 0x139   :  { %896 = vst [vmem:[#allocation8 + $0xf8] sm:$0xff] %v864_v44  ;;  %v863_v52 = vsel %vm799_vm1, %v571_v61, %v831_v45  ;;  %328 = vst [vmem:[#allocation7 + $0x60] sm:$0xff] %v217_v1 }
 0x13a   :  { %895 = vst [vmem:[#allocation8 + $0xf0] sm:$0xff] %v863_v52  ;;  %v1090_v3 = vpop.f32.mrb[14].mxu1 }
 0x13b   :  { %v1066_v46 = vpop.f32.mrb[14].mxu0  ;;  %347 = vst [vmem:[#allocation7 + $0xf8] sm:$0xff] %v1090_v3  ;;  %v307_v30 = vpop.f32.mrb[15].mxu1 }
 0x13c   :  { %1265 = shalt.err (!%p1262_p6)
}
 0x13d   :  { %s1266_s16 = scalar_lea.hbm %s1838_s3, 4096 }
 0x13e   :  { %p1267_p7 = scmp.ne.s32.totalorder %s1838_s3, %s1266_s16  ;;  %p1270_p8 = scmp.lt.u32.totalorder %s1266_s16, %s1838_s3 }
 0x140   :  { %p1272_p9 = pnand %p1270_p8, %p1267_p7 }
 0x142   :  { %1275 = shalt.err (!%p1272_p9)
}
 0x143   :  { %920 = dma.vmem_to_hbm [thread:$0]  %s915_s10, 4096, %s1838_s3, [#allocation9], %s1307_s22, %s1307_s22, %s1308_s23   ;;  %331 = vst [vmem:[#allocation7 + $0x78] sm:$0xff] %v1066_v46  ;;  %v227_v28 = vpop.f32.mrb[15].mxu0  ;;  %346 = vst [vmem:[#allocation7 + $0xf0] sm:$0xff] %v307_v30 }
 0x144   :  { %330 = vst [vmem:[#allocation7 + $0x70] sm:$0xff] %v227_v28  ;;  %s1276_s25 = scalar_lea.vmem %s1798_s12, 4096  ;;  %p1281_p11 = scmp.lt.s32.totalorder %s1798_s12, %s1798_s12 }
 0x145   :  { %p1277_p10 = scmp.ne.s32.totalorder %s1798_s12, %s1276_s25  ;;  %p1282_p12 = scmp.lt.s32.totalorder %s1276_s25, %s1276_s25 }
 0x147   :  { %p1283_p13 = por %p1282_p12, %p1281_p11 }
 0x149   :  { %p1284_p0 = pnand %p1283_p13, %p1277_p10 }
 0x14b   :  { %1287 = shalt.err (!%p1284_p0)
}
 0x14c   :  { %s1288_s28 = scalar_lea.hbm %s1837_s2, 4096 }
 0x14d   :  { %p1289_p1 = scmp.ne.s32.totalorder %s1837_s2, %s1288_s28  ;;  %p1292_p2 = scmp.lt.u32.totalorder %s1288_s28, %s1837_s2 }
 0x14f   :  { %p1294_p3 = pnand %p1292_p2, %p1289_p1 }
 0x151   :  { %1297 = shalt.err (!%p1294_p3)
}
 0x152   :  { %908 = dma.vmem_to_hbm [thread:$0]  %s1798_s12, 4096, %s1837_s2, [#allocation4], %s1307_s22, %s1307_s22, %s1308_s23  }
 0x153   :  { %1302 = dma.done.wait [#allocation4], 4096  }
 0x154   :  { %1303 = vsyncadd [#allocation4], 4294963200 }
 0x155   :  { %1304 = dma.done.wait [#allocation9], 4096  }
 0x156   :  { %1305 = vsyncadd [#allocation9], 4294963200 }
 0x157   :  { %927 = vsyncpa [#allocation3], 1 }
 0x158   :  { %928 = vsyncpa [#allocation6], 1 }
 0x159   :  { %929 = vsyncpa [#allocation4], 1 }
 0x15a   :  { %930 = vsyncpa [#allocation9], 1 }

</bundles_post_ra>
